<compile_context>
chip_gen: v7x
topology: tpu7x:2x2x1
jax: 0.10.0
libtpu: 0.0.40
codegen_flags: <defaults>
</compile_context>

<pallas_src>
import numpy as np

import jax
import jax.numpy as jnp
from jax.experimental import pallas as pl
from jax.experimental.pallas import tpu as pltpu


# ----------------------------------------------------------------------------
# Host-side helpers: pooling / interpolation weight tables
# ----------------------------------------------------------------------------
def _adaptive_pool_matrix(in_size: int, out_size: int) -> np.ndarray:
    """(out, in) row-stochastic matrix reproducing nn.AdaptiveAvgPool2d on one axis."""
    m = np.zeros((out_size, in_size), dtype=np.float32)
    for i in range(out_size):
        start = (i * in_size) // out_size
        end = -((-(i + 1) * in_size) // out_size)  # ceil((i+1)*in/out)
        m[i, start:end] = 1.0 / float(end - start)
    return m


def _bilinear_matrix(out_size: int, in_size: int) -> np.ndarray:
    """(out, in) matrix reproducing F.interpolate(mode='bilinear',
    align_corners=True) along one axis."""
    m = np.zeros((out_size, in_size), dtype=np.float32)
    if in_size == 1:
        m[:, 0] = 1.0
        return m
    scale = (in_size - 1) / (out_size - 1) if out_size > 1 else 0.0
    for y in range(out_size):
        sy = y * scale
        i0 = min(int(np.floor(sy)), in_size - 1)
        i1 = min(i0 + 1, in_size - 1)
        frac = sy - i0
        m[y, i0] += 1.0 - frac
        m[y, i1] += frac
    return m


def _build_tables(H, W, bins, Bmax):
    """Fused, lane-dense separable tables for all bins.

    P[h*W+w, k*BB + i*Bmax + j] = pool_h^k[i,h] * pool_w^k[j,w]   (avg pool)
    U[k*BB + i*Bmax + j, h*W+w] = up_h^k[h,i]   * up_w^k[w,j]     (bilinear)
    Padded (i or j >= bin) columns/rows are zero so they never contribute.
    """
    nbins = len(bins)
    BB = Bmax * Bmax
    P = np.zeros((H * W, nbins * BB), np.float32)
    U = np.zeros((nbins * BB, H * W), np.float32)
    for k, b in enumerate(bins):
        ph = _adaptive_pool_matrix(H, b)    # (b, H)
        pw = _adaptive_pool_matrix(W, b)    # (b, W)
        uh = _bilinear_matrix(H, b)         # (H, b)
        uw = _bilinear_matrix(W, b)         # (W, b)
        p4 = np.zeros((H, W, Bmax, Bmax), np.float32)
        p4[:, :, :b, :b] = np.einsum('ih,jw->hwij', ph, pw)
        P[:, k * BB:(k + 1) * BB] = p4.reshape(H * W, BB)
        u4 = np.zeros((H, W, Bmax, Bmax), np.float32)
        u4[:, :, :b, :b] = np.einsum('hi,wj->hwij', uh, uw)
        U[k * BB:(k + 1) * BB, :] = u4.reshape(H * W, BB).T
    return P, U


# ----------------------------------------------------------------------------
# Pallas kernels
# ----------------------------------------------------------------------------
def _make_pool_kernel(nbins, BB, St, write_identity):
    """Stage 1: fused adaptive avg-pool (all bins, one matmul per tile,
    accumulated in VMEM), folded 1x1 conv/BN + ReLU on the last tile.
    Optionally streams the identity channels straight into the output slab.

    refs: x (1,Cin,St) | P (HWp, nbins*BB) resident | W (nbins,Cr,Cin) |
          shift (Cr, nbins*BB) | feat (1,Cr,nbins*BB) [| xout (1,Cin,St)] |
          acc scratch (Cin, nbins*BB)
    """
    def kernel(x_ref, p_ref, w_ref, shift_ref, *refs):
        if write_identity:
            feat_ref, xout_ref, acc_ref = refs
        else:
            feat_ref, acc_ref = refs
        t = pl.program_id(1)

        @pl.when(t == 0)
        def _init():
            acc_ref[...] = jnp.zeros_like(acc_ref)

        x = x_ref[0]                                            # (Cin, St)
        row = pl.multiple_of(t * St, 128)
        p_tile = p_ref[pl.ds(row, St), :]                       # (St, nbins*BB)
        acc_ref[...] += jnp.dot(x, p_tile, preferred_element_type=jnp.float32)

        if write_identity:
            xout_ref[0] = x.astype(xout_ref.dtype)              # identity channels

        @pl.when(t == pl.num_programs(1) - 1)
        def _finalize():
            for b in range(nbins):                              # static unroll
                sl = slice(b * BB, (b + 1) * BB)
                feat = jnp.dot(w_ref[b], acc_ref[:, sl].astype(w_ref.dtype),
                               preferred_element_type=jnp.float32)   # (Cr, BB)
                feat_ref[0, :, sl] = jnp.maximum(
                    feat + shift_ref[:, sl], 0.0).astype(feat_ref.dtype)
    return kernel


def _make_upsample_branches_kernel(nbins, BB, Cr, St):
    """Stage 2 (aliased path): bilinear upsample, branch channels only; the
    identity channels were already written by stage 1 into the aliased slab."""
    def kernel(feat_ref, u_ref, slab_ref, o_ref):
        del slab_ref                      # aliased to o_ref, never touched here
        col = pl.multiple_of(pl.program_id(1) * St, 128)
        for b in range(nbins):
            fb = feat_ref[0, :, b * BB:(b + 1) * BB]            # (Cr, BB)
            ub = u_ref[b * BB:(b + 1) * BB, pl.ds(col, St)]     # (BB, St)
            o_ref[0, b * Cr:(b + 1) * Cr, :] = jnp.dot(
                fb.astype(ub.dtype), ub,
                preferred_element_type=jnp.float32).astype(o_ref.dtype)
    return kernel


def _make_upsample_full_kernel(nbins, BB, Cin, Cr, St, slice_stores):
    """Stage 2 (fallback path): writes [x, branch_0, ..., branch_{nbins-1}] for
    the full channel block.  Direct slice-stores when channel offsets are
    8-aligned; otherwise a single concatenated store (small odd Cin/Cr only)."""
    def kernel(feat_ref, u_ref, x_ref, o_ref):
        col = pl.multiple_of(pl.program_id(1) * St, 128)
        ups = []
        for b in range(nbins):
            fb = feat_ref[0, :, b * BB:(b + 1) * BB]            # (Cr, BB)
            ub = u_ref[b * BB:(b + 1) * BB, pl.ds(col, St)]     # (BB, St)
            ups.append(jnp.dot(fb.astype(ub.dtype), ub,
                               preferred_element_type=jnp.float32))
        if slice_stores:
            o_ref[0, :Cin, :] = x_ref[0].astype(o_ref.dtype)
            for b in range(nbins):
                o_ref[0, Cin + b * Cr: Cin + (b + 1) * Cr, :] = \
                    ups[b].astype(o_ref.dtype)
        else:
            o_ref[0] = jnp.concatenate(
                [x_ref[0].astype(jnp.float32)] + ups, axis=0).astype(o_ref.dtype)
    return kernel


# ----------------------------------------------------------------------------
# Wrapper
# ----------------------------------------------------------------------------
def _vmem_capacity_bytes():
    try:
        info = pltpu.get_tpu_info()
        cap = getattr(info, "vmem_capacity_bytes", None)
        if cap:
            return int(cap)
    except Exception:
        pass
    return 64 << 20        # conservative default (v7x per-TensorCore VMEM)


def ppm_forward(x_nchw, params, bins, spatial_tile=None):
    """x_nchw: (N, Cin, H, W) -> (N, Cin + len(bins)*Cr, H, W), matching
    torch.cat([x] + [upsample(f(x)) for f in features], dim=1)."""
    N, Cin, H, W = x_nchw.shape
    Cr = params[0][0].shape[1]
    nbins = len(bins)
    Cb = nbins * Cr                         # branch (pyramid) channels
    Ctot = Cin + Cb
    Bmax = -(-max(bins) // 8) * 8           # pad pyramid grid to multiple of 8
    BB = Bmax * Bmax
    NBB = nbins * BB                        # fused lane-dense pooled width
    HW = H * W

    out_dtype = x_nchw.dtype
    cdt = x_nchw.dtype                      # compute dtype (bf16 path supported)
    db_c = jnp.dtype(cdt).itemsize
    db_o = jnp.dtype(out_dtype).itemsize

    # Identity pass-through + aliasing needs block-expressible channel offsets.
    alias_path = (Cr % 8 == 0) and (Cb % 8 == 0) and (Cin % Cb == 0)
    aligned = (Cin % 8 == 0) and (Cr % 8 == 0)

    cap = _vmem_capacity_bytes()
    budget = int(cap * 0.45)
    vmem_limit = int(cap * 0.85)

    def working_set(st, hwp):
        tables = 2 * hwp * NBB * db_c                        # P (s1) / U (s2)
        s1 = (tables
              + nbins * Cr * Cin * db_c                      # folded conv weight
              + Cr * NBB * 4                                 # BN shift
              + Cin * NBB * 4                                # pooled accumulator
              + 2 * Cr * NBB * db_c                          # feats block
              + 2 * Cin * st * db_c                          # x tile (2-buffered)
              + (2 * Cin * st * db_o if alias_path else 0))  # identity pass-through
        out_ch = Cb if alias_path else Ctot
        s2 = (tables
              + 2 * Cr * NBB * db_c
              + 2 * out_ch * st * db_o
              + (0 if alias_path else 2 * Cin * st * db_c))
        return max(s1, s2)

    if spatial_tile is not None:
        St = int(spatial_tile)
        if St % 128 != 0:
            raise ValueError("spatial_tile must be a multiple of 128")
    else:
        max_k = -(-HW // 128)
        St = 128
        for k in range(max_k, 0, -1):       # largest tile that fits the budget
            st = k * 128
            hwp = -(-HW // st) * st
            if working_set(st, hwp) <= budget:
                St = st
                break
    HWp = -(-HW // St) * St                  # pad flattened spatial axis
    T = HWp // St

    # Host-side separable pool / bilinear tables, fused over bins (lane-dense).
    P_np, U_np = _build_tables(H, W, bins, Bmax)
    if HWp != HW:
        P_np = np.pad(P_np, ((0, HWp - HW), (0, 0)))   # zero rows: pad pixels inert
        U_np = np.pad(U_np, ((0, 0), (0, HWp - HW)))   # zero cols: pad outputs = 0
    P_all = jnp.asarray(P_np, dtype=cdt)               # (HWp, NBB)
    U_all = jnp.asarray(U_np, dtype=cdt)               # (NBB, HWp)

    # Fold BN scale into the conv weight; keep the shift as a pre-ReLU bias
    # broadcast lane-dense over each bin's BB columns.
    w_all = jnp.stack([(w * scale[None, :]).T
                       for (w, scale, _) in params]).astype(cdt)      # (nbins,Cr,Cin)
    shift_all = jnp.concatenate(
        [jnp.broadcast_to(shift[:, None], (Cr, BB)) for (_, _, shift) in params],
        axis=1).astype(jnp.float32)                                   # (Cr, NBB)

    x_flat = x_nchw.reshape(N, Cin, HW)
    if HWp != HW:
        x_flat = jnp.pad(x_flat, ((0, 0), (0, 0), (0, HWp - HW)))

    # ---------------- Stage 1: fused adaptive pool + folded conv/BN + ReLU ----
    if alias_path:
        out_shape_1 = (jax.ShapeDtypeStruct((N, Cr, NBB), cdt),
                       jax.ShapeDtypeStruct((N, Ctot, HWp), out_dtype))
        out_specs_1 = (pl.BlockSpec((1, Cr, NBB), lambda n, t: (n, 0, 0)),
                       pl.BlockSpec((1, Cin, St), lambda n, t: (n, 0, t)))
    else:
        out_shape_1 = jax.ShapeDtypeStruct((N, Cr, NBB), cdt)
        out_specs_1 = pl.BlockSpec((1, Cr, NBB), lambda n, t: (n, 0, 0))

    stage1 = pl.pallas_call(
        _make_pool_kernel(nbins, BB, St, alias_path),
        out_shape=out_shape_1,
        grid=(N, T),
        in_specs=[
            pl.BlockSpec((1, Cin, St), lambda n, t: (n, 0, t)),     # x tile
            pl.BlockSpec((HWp, NBB), lambda n, t: (0, 0)),          # P, VMEM-resident
            pl.BlockSpec((nbins, Cr, Cin), lambda n, t: (0, 0, 0)),
            pl.BlockSpec((Cr, NBB), lambda n, t: (0, 0)),
        ],
        out_specs=out_specs_1,
        scratch_shapes=[pltpu.VMEM((Cin, NBB), jnp.float32)],
        compiler_params=pltpu.CompilerParams(
            dimension_semantics=("parallel", "arbitrary"),
            vmem_limit_bytes=vmem_limit),
    )(x_flat, P_all, w_all, shift_all)

    # ---------------- Stage 2: bilinear upsample into the concatenated output -
    if alias_path:
        feats, slab = stage1
        cblk = Cin // Cb                       # channel block index of branches
        out_flat = pl.pallas_call(
            _make_upsample_branches_kernel(nbins, BB, Cr, St),
            out_shape=jax.ShapeDtypeStruct((N, Ctot, HWp), out_dtype),
            grid=(N, T),
            in_specs=[
                pl.BlockSpec((1, Cr, NBB), lambda n, t: (n, 0, 0)),
                pl.BlockSpec((NBB, HWp), lambda n, t: (0, 0)),      # U, VMEM-resident
                pl.BlockSpec(memory_space=pl.ANY),                  # aliased slab
            ],
            out_specs=pl.BlockSpec((1, Cb, St), lambda n, t: (n, cblk, t)),
            input_output_aliases={2: 0},
            compiler_params=pltpu.CompilerParams(
                dimension_semantics=("parallel", "parallel"),
                vmem_limit_bytes=vmem_limit),
        )(feats, U_all, slab)
    else:
        feats = stage1
        out_flat = pl.pallas_call(
            _make_upsample_full_kernel(nbins, BB, Cin, Cr, St, aligned),
            out_shape=jax.ShapeDtypeStruct((N, Ctot, HWp), out_dtype),
            grid=(N, T),
            in_specs=[
                pl.BlockSpec((1, Cr, NBB), lambda n, t: (n, 0, 0)),
                pl.BlockSpec((NBB, HWp), lambda n, t: (0, 0)),      # U, VMEM-resident
                pl.BlockSpec((1, Cin, St), lambda n, t: (n, 0, t)),
            ],
            out_specs=pl.BlockSpec((1, Ctot, St), lambda n, t: (n, 0, t)),
            compiler_params=pltpu.CompilerParams(
                dimension_semantics=("parallel", "parallel"),
                vmem_limit_bytes=vmem_limit),
        )(feats, U_all, x_flat)

    if HWp != HW:
        out_flat = out_flat[:, :, :HW]
    return out_flat.reshape(N, Ctot, H, W)


# ----------------------------------------------------------------------------
# Deterministic parameter init (mirrors nn.Conv2d(in,red,1,bias=False)+BatchNorm)
# ----------------------------------------------------------------------------
def init_params(key, in_dim, reduction_dim, bins):
    params = []
    eps = 1e-5
    for _ in bins:
        key, k1 = jax.random.split(key)
        # PyTorch conv weight is (Cr, Cin, 1, 1); stored here transposed as (Cin, Cr).
        w = 0.1 * jax.random.normal(k1, (in_dim, reduction_dim), jnp.float32)
        gamma = 1.0 + 0.1 * jnp.arange(reduction_dim, dtype=jnp.float32)
        beta = 0.05 * jnp.arange(reduction_dim, dtype=jnp.float32)
        run_mean = 0.02 * jnp.arange(reduction_dim, dtype=jnp.float32) - 0.1
        run_var = 1.0 + 0.03 * jnp.arange(reduction_dim, dtype=jnp.float32)
        scale = gamma / jnp.sqrt(run_var + eps)
        shift = beta - run_mean * scale
        params.append((w, scale, shift))
    return params


# ----------------------------------------------------------------------------
# Pure-JAX reference (no Pallas) for correctness checks
# ----------------------------------------------------------------------------
def ppm_reference(x_nchw, params, bins):
    N, Cin, H, W = x_nchw.shape
    outs = [x_nchw]
    for b, (w, scale, shift) in zip(bins, params):
        rows = []
        for i in range(b):
            hs = (i * H) // b
            he = -((-(i + 1) * H) // b)
            cols = []
            for j in range(b):
                ws = (j * W) // b
                we = -((-(j + 1) * W) // b)
                cols.append(jnp.mean(x_nchw[:, :, hs:he, ws:we], axis=(2, 3)))
            rows.append(jnp.stack(cols, axis=-1))            # (N, Cin, b)
        pooled = jnp.stack(rows, axis=-2)                     # (N, Cin, b, b)
        feat = jnp.einsum('ncij,cr->nrij', pooled, w)
        feat = jnp.maximum(
            feat * scale[None, :, None, None] + shift[None, :, None, None], 0.0)
        uh = jnp.asarray(_bilinear_matrix(H, b))
        uw = jnp.asarray(_bilinear_matrix(W, b))
        up = jnp.einsum('hi,nrij,wj->nrhw', uh, feat, uw)
        outs.append(up)
    return jnp.concatenate(outs, axis=1)


# ----------------------------------------------------------------------------
if __name__ == "__main__":
    key = jax.random.PRNGKey(0)
    bins = (1, 2, 3, 6)
    reduction_dim = 8

    # Case 1: primary small shape (Cin not 8-aligned -> full-write stage 2),
    #         two spatial tiles exercising the fused accumulation.
    N, Cin, H, W = 2, 4, 16, 16
    key, kx, kp = jax.random.split(key, 3)
    x = jax.random.normal(kx, (N, Cin, H, W), jnp.float32)
    params = init_params(kp, Cin, reduction_dim, bins)
    out = jax.block_until_ready(ppm_forward(x, params, bins, spatial_tile=128))
    assert out.shape == (N, Cin + len(bins) * reduction_dim, H, W), out.shape
    ref = jax.block_until_ready(ppm_reference(x, params, bins))
    np.testing.assert_allclose(np.asarray(out), np.asarray(ref),
                               rtol=1e-4, atol=1e-5)

    # Case 2: Cin % (nbins*Cr) == 0 -> identity pass-through from stage 1 +
    #         input_output_aliases path (x read from HBM only once).
    N2, Cin2 = 1, 32
    key, kx2, kp2 = jax.random.split(key, 3)
    x2 = jax.random.normal(kx2, (N2, Cin2, H, W), jnp.float32)
    params2 = init_params(kp2, Cin2, reduction_dim, bins)
    out2 = jax.block_until_ready(ppm_forward(x2, params2, bins, spatial_tile=128))
    ref2 = jax.block_until_ready(ppm_reference(x2, params2, bins))
    np.testing.assert_allclose(np.asarray(out2), np.asarray(ref2),
                               rtol=1e-4, atol=1e-5)

    # Case 3: non-128-divisible spatial size -> padded / tiled path.
    H3 = W3 = 12
    key, kx3 = jax.random.split(key)
    x3 = jax.random.normal(kx3, (N, Cin, H3, W3), jnp.float32)
    out3 = jax.block_until_ready(ppm_forward(x3, params, bins, spatial_tile=128))
    ref3 = jax.block_until_ready(ppm_reference(x3, params, bins))
    np.testing.assert_allclose(np.asarray(out3), np.asarray(ref3),
                               rtol=1e-4, atol=1e-5)

    # Case 4: aligned but non-aliasable Cin -> direct slice-store fallback.
    N4, Cin4 = 1, 8
    key, kx4, kp4 = jax.random.split(key, 3)
    x4 = jax.random.normal(kx4, (N4, Cin4, H, W), jnp.float32)
    params4 = init_params(kp4, Cin4, reduction_dim, bins)
    out4 = jax.block_until_ready(ppm_forward(x4, params4, bins, spatial_tile=128))
    ref4 = jax.block_until_ready(ppm_reference(x4, params4, bins))
    np.testing.assert_allclose(np.asarray(out4), np.asarray(ref4),
                               rtol=1e-4, atol=1e-5)

    # Case 5: bf16 activations (halved HBM traffic); loose tolerance smoke test
    #         with the automatic, VMEM-budget-aware tile picker.
    out5 = jax.block_until_ready(ppm_forward(x2.astype(jnp.bfloat16), params2, bins))
    np.testing.assert_allclose(np.asarray(out5.astype(jnp.float32)),
                               np.asarray(ref2), rtol=1e-1, atol=1e-1)

    print("KERNEL_OK")
</pallas_src>

<mosaic_0001>
module attributes {stable_mosaic.version = 11 : i64} {
  func.func @kernel(%arg0: i32, %arg1: i32, %arg2: memref<1x4x128xf32, #tpu.memory_space<vmem>>, %arg3: memref<256x256xf32, #tpu.memory_space<vmem>>, %arg4: memref<4x8x4xf32, #tpu.memory_space<vmem>>, %arg5: memref<8x256xf32, #tpu.memory_space<vmem>>, %arg6: memref<1x8x256xf32, #tpu.memory_space<vmem>>, %arg7: memref<4x256xf32, #tpu.memory_space<vmem>>) attributes {dimension_semantics = [#tpu.dimension_semantics<parallel>, #tpu.dimension_semantics<arbitrary>], iteration_bounds = array<i64: 2, 2>, scalar_prefetch = 0 : i64, scratch_operands = 1 : i64, tpu.core_type = #tpu.core_type<tc>, window_params = [{transform_indices = @transform_0, window_bounds = array<i64: 1, 4, 128>}, {pipeline_mode = #tpu.pipeline_mode<synchronous>, transform_indices = @transform_1, window_bounds = array<i64: 256, 256>}, {pipeline_mode = #tpu.pipeline_mode<synchronous>, transform_indices = @transform_2, window_bounds = array<i64: 4, 8, 4>}, {pipeline_mode = #tpu.pipeline_mode<synchronous>, transform_indices = @transform_3, window_bounds = array<i64: 8, 256>}, {transform_indices = @transform_4, window_bounds = array<i64: 1, 8, 256>}]} {
    %c0_i32 = arith.constant 0 : i32
    %0 = arith.cmpi eq, %arg1, %c0_i32 : i32
    %1 = arith.extui %0 : i1 to i32
    %c0_i32_0 = arith.constant 0 : i32
    %2 = arith.cmpi ne, %1, %c0_i32_0 : i32
    scf.if %2 {
      %cst_9 = arith.constant 0.000000e+00 : f32
      %16 = vector.broadcast %cst_9 : f32 to vector<4x256xf32>
      %c0_10 = arith.constant 0 : index
      %c0_11 = arith.constant 0 : index
      %17 = vector.load %arg7[%c0_10, %c0_11] : memref<4x256xf32, #tpu.memory_space<vmem>>, vector<4x256xf32>
      tpu.vector_store %arg7[%c0_10, %c0_11], %16 {strides = array<i32>} : memref<4x256xf32, #tpu.memory_space<vmem>>, vector<4x256xf32>,
    } else {
    }
    %c0 = arith.constant 0 : index
    %c0_1 = arith.constant 0 : index
    %c0_2 = arith.constant 0 : index
    %3 = vector.load %arg2[%c0, %c0_1, %c0_2] : memref<1x4x128xf32, #tpu.memory_space<vmem>>, vector<1x4x128xf32>
    %4 = vector.shape_cast %3 : vector<1x4x128xf32> to vector<4x128xf32>
    %c128_i32 = arith.constant 128 : i32
    %5 = arith.muli %arg1, %c128_i32 : i32
    %6 = tpu.assume_multiple %5, 128 : i32
    %7 = arith.index_cast %6 : i32 to index
    %c0_3 = arith.constant 0 : index
    %8 = vector.load %arg3[%7, %c0_3] : memref<256x256xf32, #tpu.memory_space<vmem>>, vector<128x256xf32>
    %c0_4 = arith.constant 0 : index
    %c0_5 = arith.constant 0 : index
    %9 = vector.load %arg7[%c0_4, %c0_5] : memref<4x256xf32, #tpu.memory_space<vmem>>, vector<4x256xf32>
    %cst = arith.constant dense<0.000000e+00> : vector<4x256xf32>
    %10 = tpu.matmul %4, %8, %cst {dimension_numbers = #tpu.dot_dimension_numbers<[1], [0], [0], [1], [0, 0, 1, 1], [], []>} : vector<4x128xf32>, vector<128x256xf32>, vector<4x256xf32> -> vector<4x256xf32>
    %11 = arith.addf %9, %10 : vector<4x256xf32>
    %c0_6 = arith.constant 0 : index
    %c0_7 = arith.constant 0 : index
    %12 = vector.load %arg7[%c0_6, %c0_7] : memref<4x256xf32, #tpu.memory_space<vmem>>, vector<4x256xf32>
    tpu.vector_store %arg7[%c0_6, %c0_7], %11 {strides = array<i32>} : memref<4x256xf32, #tpu.memory_space<vmem>>, vector<4x256xf32>,
    %c1_i32 = arith.constant 1 : i32
    %13 = arith.cmpi eq, %arg1, %c1_i32 : i32
    %14 = arith.extui %13 : i1 to i32
    %c0_i32_8 = arith.constant 0 : i32
    %15 = arith.cmpi ne, %14, %c0_i32_8 : i32
    scf.if %15 {
      %c0_9 = arith.constant 0 : index
      %c0_10 = arith.constant 0 : index
      %c0_11 = arith.constant 0 : index
      %16 = vector.load %arg4[%c0_9, %c0_10, %c0_11] : memref<4x8x4xf32, #tpu.memory_space<vmem>>, vector<1x8x4xf32>
      %17 = vector.shape_cast %16 : vector<1x8x4xf32> to vector<8x4xf32>
      %c0_12 = arith.constant 0 : index
      %c0_13 = arith.constant 0 : index
      %18 = vector.load %arg7[%c0_12, %c0_13] : memref<4x256xf32, #tpu.memory_space<vmem>>, vector<4x64xf32>
      %cst_14 = arith.constant dense<0.000000e+00> : vector<8x64xf32>
      %19 = tpu.matmul %17, %18, %cst_14 {dimension_numbers = #tpu.dot_dimension_numbers<[1], [0], [0], [1], [0, 0, 1, 1], [], []>} : vector<8x4xf32>, vector<4x64xf32>, vector<8x64xf32> -> vector<8x64xf32>
      %c0_15 = arith.constant 0 : index
      %c0_16 = arith.constant 0 : index
      %20 = vector.load %arg5[%c0_15, %c0_16] : memref<8x256xf32, #tpu.memory_space<vmem>>, vector<8x64xf32>
      %21 = arith.addf %19, %20 : vector<8x64xf32>
      %cst_17 = arith.constant 0.000000e+00 : f32
      %22 = vector.broadcast %cst_17 : f32 to vector<8x64xf32>
      %23 = arith.maximumf %21, %22 : vector<8x64xf32>
      %c0_18 = arith.constant 0 : index
      %c0_19 = arith.constant 0 : index
      %c0_20 = arith.constant 0 : index
      %24 = vector.load %arg6[%c0_18, %c0_19, %c0_20] : memref<1x8x256xf32, #tpu.memory_space<vmem>>, vector<1x8x64xf32>
      %25 = vector.shape_cast %24 : vector<1x8x64xf32> to vector<8x64xf32>
      %26 = vector.shape_cast %23 : vector<8x64xf32> to vector<1x8x64xf32>
      tpu.vector_store %arg6[%c0_18, %c0_19, %c0_20], %26 {strides = array<i32>} : memref<1x8x256xf32, #tpu.memory_space<vmem>>, vector<1x8x64xf32>,
      %c1 = arith.constant 1 : index
      %c0_21 = arith.constant 0 : index
      %c0_22 = arith.constant 0 : index
      %27 = vector.load %arg4[%c1, %c0_21, %c0_22] : memref<4x8x4xf32, #tpu.memory_space<vmem>>, vector<1x8x4xf32>
      %28 = vector.shape_cast %27 : vector<1x8x4xf32> to vector<8x4xf32>
      %c0_23 = arith.constant 0 : index
      %c64 = arith.constant 64 : index
      %29 = vector.load %arg7[%c0_23, %c64] : memref<4x256xf32, #tpu.memory_space<vmem>>, vector<4x64xf32>
      %cst_24 = arith.constant dense<0.000000e+00> : vector<8x64xf32>
      %30 = tpu.matmul %28, %29, %cst_24 {dimension_numbers = #tpu.dot_dimension_numbers<[1], [0], [0], [1], [0, 0, 1, 1], [], []>} : vector<8x4xf32>, vector<4x64xf32>, vector<8x64xf32> -> vector<8x64xf32>
      %c0_25 = arith.constant 0 : index
      %c64_26 = arith.constant 64 : index
      %31 = vector.load %arg5[%c0_25, %c64_26] : memref<8x256xf32, #tpu.memory_space<vmem>>, vector<8x64xf32>
      %32 = arith.addf %30, %31 : vector<8x64xf32>
      %cst_27 = arith.constant 0.000000e+00 : f32
      %33 = vector.broadcast %cst_27 : f32 to vector<8x64xf32>
      %34 = arith.maximumf %32, %33 : vector<8x64xf32>
      %c0_28 = arith.constant 0 : index
      %c0_29 = arith.constant 0 : index
      %c64_30 = arith.constant 64 : index
      %35 = vector.load %arg6[%c0_28, %c0_29, %c64_30] : memref<1x8x256xf32, #tpu.memory_space<vmem>>, vector<1x8x64xf32>
      %36 = vector.shape_cast %35 : vector<1x8x64xf32> to vector<8x64xf32>
      %37 = vector.shape_cast %34 : vector<8x64xf32> to vector<1x8x64xf32>
      tpu.vector_store %arg6[%c0_28, %c0_29, %c64_30], %37 {strides = array<i32>} : memref<1x8x256xf32, #tpu.memory_space<vmem>>, vector<1x8x64xf32>,
      %c2 = arith.constant 2 : index
      %c0_31 = arith.constant 0 : index
      %c0_32 = arith.constant 0 : index
      %38 = vector.load %arg4[%c2, %c0_31, %c0_32] : memref<4x8x4xf32, #tpu.memory_space<vmem>>, vector<1x8x4xf32>
      %39 = vector.shape_cast %38 : vector<1x8x4xf32> to vector<8x4xf32>
      %c0_33 = arith.constant 0 : index
      %c128 = arith.constant 128 : index
      %40 = vector.load %arg7[%c0_33, %c128] : memref<4x256xf32, #tpu.memory_space<vmem>>, vector<4x64xf32>
      %cst_34 = arith.constant dense<0.000000e+00> : vector<8x64xf32>
      %41 = tpu.matmul %39, %40, %cst_34 {dimension_numbers = #tpu.dot_dimension_numbers<[1], [0], [0], [1], [0, 0, 1, 1], [], []>} : vector<8x4xf32>, vector<4x64xf32>, vector<8x64xf32> -> vector<8x64xf32>
      %c0_35 = arith.constant 0 : index
      %c128_36 = arith.constant 128 : index
      %42 = vector.load %arg5[%c0_35, %c128_36] : memref<8x256xf32, #tpu.memory_space<vmem>>, vector<8x64xf32>
      %43 = arith.addf %41, %42 : vector<8x64xf32>
      %cst_37 = arith.constant 0.000000e+00 : f32
      %44 = vector.broadcast %cst_37 : f32 to vector<8x64xf32>
      %45 = arith.maximumf %43, %44 : vector<8x64xf32>
      %c0_38 = arith.constant 0 : index
      %c0_39 = arith.constant 0 : index
      %c128_40 = arith.constant 128 : index
      %46 = vector.load %arg6[%c0_38, %c0_39, %c128_40] : memref<1x8x256xf32, #tpu.memory_space<vmem>>, vector<1x8x64xf32>
      %47 = vector.shape_cast %46 : vector<1x8x64xf32> to vector<8x64xf32>
      %48 = vector.shape_cast %45 : vector<8x64xf32> to vector<1x8x64xf32>
      tpu.vector_store %arg6[%c0_38, %c0_39, %c128_40], %48 {strides = array<i32>} : memref<1x8x256xf32, #tpu.memory_space<vmem>>, vector<1x8x64xf32>,
      %c3 = arith.constant 3 : index
      %c0_41 = arith.constant 0 : index
      %c0_42 = arith.constant 0 : index
      %49 = vector.load %arg4[%c3, %c0_41, %c0_42] : memref<4x8x4xf32, #tpu.memory_space<vmem>>, vector<1x8x4xf32>
      %50 = vector.shape_cast %49 : vector<1x8x4xf32> to vector<8x4xf32>
      %c0_43 = arith.constant 0 : index
      %c192 = arith.constant 192 : index
      %51 = vector.load %arg7[%c0_43, %c192] : memref<4x256xf32, #tpu.memory_space<vmem>>, vector<4x64xf32>
      %cst_44 = arith.constant dense<0.000000e+00> : vector<8x64xf32>
      %52 = tpu.matmul %50, %51, %cst_44 {dimension_numbers = #tpu.dot_dimension_numbers<[1], [0], [0], [1], [0, 0, 1, 1], [], []>} : vector<8x4xf32>, vector<4x64xf32>, vector<8x64xf32> -> vector<8x64xf32>
      %c0_45 = arith.constant 0 : index
      %c192_46 = arith.constant 192 : index
      %53 = vector.load %arg5[%c0_45, %c192_46] : memref<8x256xf32, #tpu.memory_space<vmem>>, vector<8x64xf32>
      %54 = arith.addf %52, %53 : vector<8x64xf32>
      %cst_47 = arith.constant 0.000000e+00 : f32
      %55 = vector.broadcast %cst_47 : f32 to vector<8x64xf32>
      %56 = arith.maximumf %54, %55 : vector<8x64xf32>
      %c0_48 = arith.constant 0 : index
      %c0_49 = arith.constant 0 : index
      %c192_50 = arith.constant 192 : index
      %57 = vector.load %arg6[%c0_48, %c0_49, %c192_50] : memref<1x8x256xf32, #tpu.memory_space<vmem>>, vector<1x8x64xf32>
      %58 = vector.shape_cast %57 : vector<1x8x64xf32> to vector<8x64xf32>
      %59 = vector.shape_cast %56 : vector<8x64xf32> to vector<1x8x64xf32>
      tpu.vector_store %arg6[%c0_48, %c0_49, %c192_50], %59 {strides = array<i32>} : memref<1x8x256xf32, #tpu.memory_space<vmem>>, vector<1x8x64xf32>,
    } else {
    }
    return
  }
  func.func @transform_0(%arg0: i32, %arg1: i32) -> (i32, i32, i32) {
    %c0_i32 = arith.constant 0 : i32
    %c0_i32_0 = arith.constant 0 : i32
    return %arg0, %c0_i32, %arg1 : i32, i32, i32
  }
  func.func @transform_1(%arg0: i32, %arg1: i32) -> (i32, i32) {
    %c0_i32 = arith.constant 0 : i32
    %c0_i32_0 = arith.constant 0 : i32
    %c0_i32_1 = arith.constant 0 : i32
    return %c0_i32, %c0_i32_0 : i32, i32
  }
  func.func @transform_2(%arg0: i32, %arg1: i32) -> (i32, i32, i32) {
    %c0_i32 = arith.constant 0 : i32
    %c0_i32_0 = arith.constant 0 : i32
    %c0_i32_1 = arith.constant 0 : i32
    %c0_i32_2 = arith.constant 0 : i32
    return %c0_i32, %c0_i32_0, %c0_i32_1 : i32, i32, i32
  }
  func.func @transform_3(%arg0: i32, %arg1: i32) -> (i32, i32) {
    %c0_i32 = arith.constant 0 : i32
    %c0_i32_0 = arith.constant 0 : i32
    %c0_i32_1 = arith.constant 0 : i32
    return %c0_i32, %c0_i32_0 : i32, i32
  }
  func.func @transform_4(%arg0: i32, %arg1: i32) -> (i32, i32, i32) {
    %c0_i32 = arith.constant 0 : i32
    %c0_i32_0 = arith.constant 0 : i32
    %c0_i32_1 = arith.constant 0 : i32
    return %arg0, %c0_i32, %c0_i32_0 : i32, i32, i32
  }
}

</mosaic_0001>

<bundles_post_ra>
// kernel: tpu_custom_call.1
= control target key start
LH: loop header
LB: loop body
LE: loop exit
PB: predicated region body
PF: predicated region fallthrough
CT: control target
= control target key end

     0   :  { %9 = vsyncpa [#allocation4], 0  ;;  %s1413_s0 = inlined_call_operand.vmem [shape: f32[2,4,256], index: 0, kind: input, shape index: {}]   ;;  %s1414_s1 = inlined_call_operand.hbm [shape: f32[256,256], index: 1, kind: input, shape index: {}]   ;;  %s1415_s2 = inlined_call_operand.vmem [shape: f32[4,8,4], index: 2, kind: input, shape index: {}]   ;;  %s1416_s3 = inlined_call_operand.vmem [shape: f32[8,256], index: 3, kind: input, shape index: {}]   ;;  %s1417_s4 = inlined_call_operand.hbm [shape: f32[2,8,256], index: 4, kind: output, shape index: {}]  }
   0x1   :  { %10 = vsyncpa [#allocation5], 0 }
   0x2   :  { %12 = vsyncpa [#allocation5 + $0x1], 0  ;;  %s1160_s15 = smov 0   ;;  %s1162_s16 = smov 0  }
   0x3   :  { %s1164_s17 = smov 0   ;;  %s1166_s18 = smov 0  }
   0x4   :  { %s1168_s19 = smov 0   ;;  %s1170_s20 = smov 0  }
   0x5   :  { %s1172_s21 = smov 0   ;;  %s1174_s22 = smov 0  }
   0x6 LB: > { %s816_s23 = sadd.s32 4294967295, %s1124_s22   ;;  %s817_s24 = sadd.s32 4294967294, %s1124_s22   ;;  %s1124_s22 = sphi %s1174_s22, %s18_s22   ;;  %s1120_s21 = sphi %s1172_s21, %s1437_s21   ;;  %s1116_s20 = sphi %s1170_s20, %s1436_s20   ;;  %s1112_s19 = sphi %s1168_s19, %s1435_s19   ;;  %s1108_s18 = sphi %s1166_s18, %s1434_s18   ;;  %s1104_s17 = sphi %s1164_s17, %s1433_s17   ;;  %s1100_s16 = sphi %s1162_s16, %s1432_s16   ;;  %s1096_s15 = sphi %s1160_s15, %s1431_s15  }
   0x7   : > { %s27_s25 = sadd.s32 1, %s1116_s20  ;;  %s30_s26 = sadd.s32 1, %s1120_s21 }
   0x8   : > { %p28_p0 = scmp.ge.s32.totalorder %s27_s25, 2  ;;  %s128_s27 = sadd.s32 1, %s1104_s17 }
   0x9   : > { %p138_p1 = scmp.ne.s32.totalorder %s1104_s17, %s1100_s16  ;;  %p139_p2 = scmp.eq.s32.totalorder %s816_s23, 3 }
   0xa   : > { %s1439_s25 = smov (%p28_p0, %s27_s25), 0  ;;  %s1441_s26 = smov (!%p28_p0, %s30_s26), %s1120_s21 }
   0xb   : > { %p1210_p3 = por %p139_p2, %p138_p1  ;;  %p144_p4 = scmp.ne.s32.totalorder %s1100_s16, %s1096_s15 }
   0xc   : > { %p32_p5 = scmp.ge.s32.totalorder %s1441_s26, 2  ;;  %p145_p6 = scmp.eq.s32.totalorder %s817_s24, 3 }
   0xd   : > { %s1422_s28 = scalar_select %p1210_p3, 1, 0 }
   0xe   : > { %p818_p7 = scmp.ge.s32.totalorder %s1124_s22, 1  ;;  %p152_p8 = scmp.lt.s32.totalorder %s1124_s22, 5 }
   0xf   : > { %s1443_s26 = smov (%p32_p5, %s1441_s26), 0  ;;  %p1220_p9 = por %p145_p6, %p144_p4 }
  0x10   : > { %p1224_p10 = pnand %p818_p7, %p152_p8  ;;  %s125_s5 = ssub.s32 %s1120_s21, %s1443_s26 }
  0x11   : > { %s1423_s29 = scalar_select %p1220_p9, 1, 0 }
  0x12   : > { %s1424_s30 = scalar_select %p1224_p10, 1, 0 }
  0x13   : > { %p126_p11 = scmp.eq.s32.totalorder %s125_s5, 0  ;;  %p915_p12 = pneg %p1224_p10 }
  0x14   : > { %p1232_p13 = scmp.eq.s32.totalorder %s816_s23, 0  ;;  %s1126_s8 = smov [#allocation3]  }
  0x15   : > { %s1237_s7 = scalar_select %p126_p11, %s1104_s17, %s128_s27  }
  0x16   : > { %s1425_s6 = scalar_select %p1232_p13, 1, 0 }
  0x17   : > { %s164_s9 = sshll.u32 %s1126_s8, 4  ;;  %p1241_p0 = pnand %p1232_p13, %p915_p12  ;;  %s165_s9 = int_to_ptr.vmem [resolvable:$true] %s164_s9 }
  0x18   : > { %s998_s13 = scalar_lea.hbm %s1414_s1, 8192 }
  0x19   : > { %p999_p1 = scmp.ne.s32.totalorder %s1414_s1, %s998_s13  ;;  %p1000_p2 = pneg %p1241_p0 }
  0x1a   : > { %p1005_p6 = scmp.lt.u32.totalorder %s998_s13, %s1414_s1 }
  0x1b   : > { %p1001_p4 = pnand %p1000_p2, %p999_p1 }
  0x1d   : > { %p1002_p5 = pneg %p1001_p4 }
  0x1f   : > { %p1007_p7 = pnand %p1005_p6, %p1002_p5 }
  0x21   : > { %1010 = shalt.err (!%p1007_p7)
}
  0x22   : > { %s1011_s5 = scalar_lea.vmem %s165_s9, 8192  ;;  %p1019_p9 = scmp.lt.s32.totalorder %s165_s9, %s165_s9 }
  0x23   : > { %p1012_p8 = scmp.ne.s32.totalorder %s165_s9, %s1011_s5  ;;  %p1020_p3 = scmp.lt.s32.totalorder %s1011_s5, %s1011_s5 }
  0x25   : > { %p1014_p11 = pnand %p1012_p8, %p1000_p2  ;;  %p1021_p13 = por %p1020_p3, %p1019_p9 }
  0x27   : > { %p1015_p12 = pneg %p1014_p11 }
  0x29   : > { %p1022_p10 = pnand %p1021_p13, %p1015_p12 }
  0x2b   : > { %1025 = shalt.err (!%p1022_p10)
}
  0x2c   : > { %s1127_s8 = smov 256   ;;  %s1128_s11 = smov 16  }
  0x2d   : > { %918 = dma.hbm_to_vmem [thread:$0]  (!%p1241_p0), %s1414_s1, 8192, %s165_s9, [#allocation4], %s1127_s8, %s1127_s8, %s1128_s11  }
  0x2e   : > { %p1427_p1 = scmp.ne.s32.totalorder %s1424_s30, 0 }
  0x2f   : > { %p1428_p4 = scmp.ne.s32.totalorder (!%p1427_p1), %s1425_s6, 0 }
  0x30   : > { %197 = sbr.rel (%p1427_p1) target bundleno = 811 (0x32b), region = 36 }
  0x37   : > { %1087 = dma.done.wait (%p1428_p4), [#allocation4], 8192  }
  0x38   : > { %1089 = vsyncadd (%p1428_p4), [#allocation4], 4294959104  ;;  %s223_s10 = sand.u32 1, %s1100_s16   ;;  %p226_p3 = scmp.lt.s32.totalorder %s1112_s19, 1 }
  0x39   : > { %s823_s13 = sshll.u32 %s223_s10, 4  ;;  %p228_p9 = scmp.lt.s32.totalorder %s1108_s18, 1 }
  0x3a   : > { %s227_s9 = scalar_select %p226_p3, %s1112_s19, 1 }
  0x3b   : > { %s229_s30 = scalar_select %p228_p9, %s1108_s18, 1 }
  0x3c   : > { %s824_s23 = sshll.u32 %s227_s9, 1  ;;  %s1279_s11 = scalar_lea.vmem [#allocation6], %s823_s13 }
  0x3d   : > { %s231_s24 = sadd.s32 %s824_s23, %s229_s30  ;;  %p826_p10 = scmp.ne.s32.totalorder %s1108_s18, 0 }
  0x3e   : > { %s825_s27 = sshll.u32 %s231_s24, 2  ;;  %v1129_v0 = vmov (!%p826_p10), 0.0  }
  0x3f   : > { %s1277_s6 = scalar_lea.vmem %s1413_s0, %s825_s27  ;;  %237 = sbr.rel (%p826_p10) target bundleno = 70 (0x46), region = 44  ;;  %238 = vst [vmem:[#allocation2] sm:$0xff] (!%p826_p10), %v1129_v0 }
  0x46 PF: > { %s827_s12 = sshll.u32 %s1108_s18, 7  ;;  %v1130_v1 = vmov 0.0   ;;  %v239_v50 = vld [vmem:[%s1277_s6] sm:$0xf]  ;;  %p830_p13 = scmp.ne.s32.totalorder %s1108_s18, 1 }
  0x47   : > { %s241_s14 = sshra.s32 %s827_s12, 3  ;;  %343 = vmatprep.mubr.f32.mxu0 %v1130_v1  ;;  %v278_v52 = vld [vmem:[#allocation2] sm:$0xff]  ;;  %s1131_s13 = smov (!%p830_p13), 64   ;;  %v1132_v57 = vmov (!%p830_p13), 0.0   ;;  %vm1133_vm0 = vmmov (!%p830_p13), 0   ;;  %vm367_vm1 = vcmask (!%p830_p13), 1043456  }
  0x48   : > { %s847_s9 = sshll.u32 %s241_s14, 4  ;;  %862 = vmatprep.subr.mxu1 (!%p830_p13), %v1132_v57  ;;  %v447_v58 = vld [vmem:[%s1416_s3] sm:$0xff] (!%p830_p13)  ;;  %864 = vmatprep.mubr.msk.f32.mxu1 (!%p830_p13), %vm1133_vm0, %v1132_v57  ;;  %v622_v62 = vld [vmem:[%s1416_s3 + $0x8] sm:$0xff] (!%p830_p13)  ;;  %vm363_vm2 = vcmask (!%p830_p13), 31744   ;;  %v836_v0 = vld [vmem:[%s1415_s2 + $0x10] sm:$0xff] (!%p830_p13)  ;;  %vm442_vm3 = vcmask (!%p830_p13), 523264  }
  0x49   : > { %s1283_s30 = scalar_lea.vmem [#allocation3], %s847_s9  ;;  %452 = vrot.lane.b32.xlu1 (!%p830_p13), %v447_v58, %s1131_s13  ;;  %v360_v61 = vld [vmem:[%s1415_s2] sm:$0xff] (!%p830_p13)  ;;  %v833_v1 = vld [vmem:[%s1415_s2 + $0x8] sm:$0xff] (!%p830_p13)  ;;  %vm535_vm4 = vcmask (!%p830_p13), 1048064  }
  0x4a   : > { %v247_v2 = vld [vmem:[%s1283_s30 + $0x8] sm:$0xff]  ;;  %v249_v3 = vld [vmem:[%s1283_s30 + $0x18] sm:$0xff]  ;;  %v246_v4 = vld [vmem:[%s1283_s30] sm:$0xff] }
  0x4b   : > { %v877_v5 = vpack.c.bf16 %v249_v3, %v247_v2  ;;  %v248_v6 = vld [vmem:[%s1283_s30 + $0x10] sm:$0xff]  ;;  %v251_v7 = vld [vmem:[%s1283_s30 + $0x28] sm:$0xff]  ;;  %v253_v8 = vld [vmem:[%s1283_s30 + $0x38] sm:$0xff] }
  0x4c   : > { %v879_v9 = vpack.c.bf16 %v248_v6, %v246_v4  ;;  %v881_v10 = vpack.c.bf16 %v253_v8, %v251_v7  ;;  %v250_v11 = vld [vmem:[%s1283_s30 + $0x20] sm:$0xff]  ;;  %v252_v12 = vld [vmem:[%s1283_s30 + $0x30] sm:$0xff]  ;;  %v255_v13 = vld [vmem:[%s1283_s30 + $0x48] sm:$0xff] }
  0x4d   : > { %878 = vmatprep.subr.bf16.mxu0 %v877_v5  ;;  %v257_v14 = vld [vmem:[%s1283_s30 + $0x58] sm:$0xff]  ;;  %v883_v15 = vpack.c.bf16 %v252_v12, %v250_v11  ;;  %v254_v17 = vld [vmem:[%s1283_s30 + $0x40] sm:$0xff]  ;;  %v256_v18 = vld [vmem:[%s1283_s30 + $0x50] sm:$0xff]  ;;  %627 = vrot.lane.b32.xlu1 (!%p830_p13), %v622_v62, %s1131_s13 }
  0x4e   : > { %880 = vmatpush1.bf16.msra.mxu0 %v879_v9  ;;  %v885_v16 = vpack.c.bf16 %v257_v14, %v255_v13  ;;  %v259_v19 = vld [vmem:[%s1283_s30 + $0x68] sm:$0xff]  ;;  %v261_v20 = vld [vmem:[%s1283_s30 + $0x78] sm:$0xff]  ;;  %v887_v21 = vpack.c.bf16 %v256_v18, %v254_v17  ;;  %v258_v23 = vld [vmem:[%s1283_s30 + $0x60] sm:$0xff] }
  0x4f   : > { %882 = vmatprep.subr.bf16.mxu0 %v881_v10  ;;  %v889_v22 = vpack.c.bf16 %v261_v20, %v259_v19  ;;  %v260_v24 = vld [vmem:[%s1283_s30 + $0x70] sm:$0xff]  ;;  %v263_v25 = vld [vmem:[%s1283_s30 + $0x88] sm:$0xff]  ;;  %v265_v26 = vld [vmem:[%s1283_s30 + $0x98] sm:$0xff] }
  0x50   : > { %v891_v27 = vpack.c.bf16 %v260_v24, %v258_v23  ;;  %v893_v28 = vpack.c.bf16 %v265_v26, %v263_v25  ;;  %v262_v29 = vld [vmem:[%s1283_s30 + $0x80] sm:$0xff]  ;;  %v264_v30 = vld [vmem:[%s1283_s30 + $0x90] sm:$0xff]  ;;  %v267_v31 = vld [vmem:[%s1283_s30 + $0xa8] sm:$0xff] }
  0x51   : > { %v269_v32 = vld [vmem:[%s1283_s30 + $0xb8] sm:$0xff]  ;;  %v895_v33 = vpack.c.bf16 %v264_v30, %v262_v29  ;;  %v266_v35 = vld [vmem:[%s1283_s30 + $0xa0] sm:$0xff]  ;;  %v268_v36 = vld [vmem:[%s1283_s30 + $0xb0] sm:$0xff] }
  0x52   : > { %884 = vmatpush1.bf16.msra.mxu0 %v883_v15  ;;  %v897_v34 = vpack.c.bf16 %v269_v32, %v267_v31  ;;  %v271_v37 = vld [vmem:[%s1283_s30 + $0xc8] sm:$0xff]  ;;  %v273_v38 = vld [vmem:[%s1283_s30 + $0xd8] sm:$0xff]  ;;  %v899_v39 = vpack.c.bf16 %v268_v36, %v266_v35  ;;  %v270_v41 = vld [vmem:[%s1283_s30 + $0xc0] sm:$0xff] }
  0x53   : > { %886 = vmatprep.subr.bf16.mxu0 %v885_v16  ;;  %v901_v40 = vpack.c.bf16 %v273_v38, %v271_v37  ;;  %v272_v42 = vld [vmem:[%s1283_s30 + $0xd0] sm:$0xff]  ;;  %v275_v43 = vld [vmem:[%s1283_s30 + $0xe8] sm:$0xff]  ;;  %v277_v44 = vld [vmem:[%s1283_s30 + $0xf8] sm:$0xff] }
  0x54   : > { %v903_v45 = vpack.c.bf16 %v272_v42, %v270_v41  ;;  %v905_v46 = vpack.c.bf16 %v277_v44, %v275_v43  ;;  %v274_v47 = vld [vmem:[%s1283_s30 + $0xe0] sm:$0xff]  ;;  %v276_v48 = vld [vmem:[%s1283_s30 + $0xf0] sm:$0xff]  ;;  %v839_v3 = vld [vmem:[%s1415_s2 + $0x18] sm:$0xff] (!%p830_p13) }
  0x55   : > { %v907_v49 = vpack.c.bf16 %v276_v48, %v274_v47 }
  0x56   : > { %888 = vmatpush1.bf16.msra.mxu0 %v887_v21 }
  0x57   : > { %890 = vmatprep.subr.bf16.mxu0 %v889_v22 }
  0x5a   : > { %892 = vmatpush1.bf16.msra.mxu0 %v891_v27 }
  0x5b   : > { %894 = vmatprep.subr.bf16.mxu0 %v893_v28 }
  0x5e   : > { %896 = vmatpush1.bf16.msra.mxu0 %v895_v33 }
  0x5f   : > { %898 = vmatprep.subr.bf16.mxu0 %v897_v34 }
  0x62   : > { %900 = vmatpush1.bf16.msra.mxu0 %v899_v39 }
  0x63   : > { %902 = vmatprep.subr.bf16.mxu0 %v901_v40 }
  0x66   : > { %904 = vmatpush1.bf16.msra.mxu0 %v903_v45 }
  0x67   : > { %906 = vmatprep.subr.bf16.mxu0 %v905_v46 }
  0x6a   : > { %908 = vmatpush1.bf16.msra.mxu0 %v907_v49 }
  0x6b   : > { %857 = vmatprep.subr.mxu0 (!%p830_p13), %v1132_v57 }
  0x6d   : > { %344 = vmatmul.mubr.f32.vlgmr.msra.gmra.mrb[0].mxu0 %v239_v50 }
  0x6e   : > { %859 = vmatprep.mubr.msk.f32.mxu0 (!%p830_p13), %vm1133_vm0, %v1132_v57 }
  0xbb   : > { %v453_v13 = vpop.permute.xlu1 (!%p830_p13), %452 }
  0xbf   : > { %v628_v17 = vpop.permute.xlu1 (!%p830_p13), %627 }
 0x140   : > { %v345_v51 = vpop.f32.mrb[0].mxu0  ;;  %359 = sbr.rel (%p830_p13) target bundleno = 786 (0x312), region = 48 }
 0x141   : > { %v347_v53 = vpop.f32.mrb[1].mxu0 }
 0x142   : > { %v352_v54 = vcombine.low %v345_v51, %v347_v53 }
 0x144   : > { %v354_v55 = vadd.f32 %v352_v54, %v278_v52 }
 0x146   : > { %355 = vst [vmem:[#allocation2] sm:$0xff] %v354_v55 }
 0x14d   : > { %v446_v56 = vld [vmem:[#allocation2] sm:$0xf]  ;;  %v621_v59 = vld [vmem:[#allocation2 + $0x4] sm:$0xf] }
 0x14e   : > { %449 = vrot.lane.b32.xlu0 %v446_v56, %s1131_s13  ;;  %v361_v60 = vld [vmem:[#allocation2] sm:$0xf]  ;;  %v539_v63 = vld [vmem:[#allocation2 + $0x4] sm:$0xf] }
 0x14f   : > { %858 = vmatpush3.msk.msra.mxu0 %vm367_vm1, %v361_v60 }
 0x150   : > { %860 = vmatmul.mubr.msk.f32.vlgmr.msra.gmra.mrb[0].mxu0 %vm363_vm2, %v360_v61  ;;  %867 = vmatprep.subr.mxu0 %v1132_v57 }
 0x151   : > { %868 = vmatpush3.msk.msra.mxu0 %vm367_vm1, %v539_v63  ;;  %869 = vmatprep.mubr.msk.f32.mxu0 %vm1133_vm0, %v1132_v57 }
 0x152   : > { %624 = vrot.lane.b32.xlu0 %v621_v59, %s1131_s13 }
 0x154   : > { %870 = vmatmul.mubr.msk.f32.vlgmr.msra.gmra.mrb[2].mxu0 %vm363_vm2, %v836_v0 }
 0x1c0   : > { %v450_v2 = vpop.permute.xlu0 %449 }
 0x1c1   : > { %863 = vmatpush3.msk.msra.mxu1 %vm367_vm1, %v450_v2 }
 0x1c2   : > { %865 = vmatmul.mubr.msk.f32.vlgmr.msra.gmra.mrb[0].mxu1 %vm363_vm2, %v833_v1  ;;  %872 = vmatprep.subr.mxu1 %v1132_v57 }
 0x1c3   : > { %874 = vmatprep.mubr.msk.f32.mxu1 %vm1133_vm0, %v1132_v57 }
 0x1c4   : > { %v625_v4 = vpop.permute.xlu0 %624 }
 0x1c5   : > { %873 = vmatpush3.msk.msra.mxu1 %vm367_vm1, %v625_v4 }
 0x1c6   : > { %875 = vmatmul.mubr.msk.f32.vlgmr.msra.gmra.mrb[2].mxu1 %vm363_vm2, %v839_v3 }
 0x223   : > { %v437_v5 = vpop.f32.mrb[0].mxu0 }
 0x224   : > { %v438_v6 = vadd.f32 %v447_v58, %v437_v5  ;;  %v861_v7 = vpop.f32.mrb[1].mxu0 }
 0x226   : > { %v441_v8 = vmax.f32 %v438_v6, 0.0 }
 0x227   : > { %v613_v9 = vpop.f32.mrb[2].mxu0 }
 0x228   : > { %443 = vst.msk [vmem:[%s1279_s11] sm:$0xff] %vm442_vm3, %v441_v8  ;;  %v614_v10 = vadd.f32 %v622_v62, %v613_v9  ;;  %v871_v11 = vpop.f32.mrb[3].mxu0 }
 0x22a   : > { %v617_v12 = vmax.f32 %v614_v10, 0.0 }
 0x22c   : > { %618 = vst.msk [vmem:[%s1279_s11 + $0x8] sm:$0xff] %vm442_vm3, %v617_v12 }
 0x295   : > { %v526_v14 = vpop.f32.mrb[0].mxu1 }
 0x296   : > { %v527_v15 = vadd.f32 %v526_v14, %v453_v13  ;;  %v866_v16 = vpop.f32.mrb[1].mxu1 }
 0x298   : > { %v530_v18 = vmax.f32 %v527_v15, 0.0 }
 0x299   : > { %v701_v19 = vpop.f32.mrb[2].mxu1 }
 0x29a   : > { %v702_v20 = vadd.f32 %v701_v19, %v628_v17  ;;  %v876_v21 = vpop.f32.mrb[3].mxu1  ;;  %532 = vrot.lane.b32.xlu0 %v530_v18, %s1131_s13 }
 0x29c   : > { %v705_v22 = vmax.f32 %v702_v20, 0.0 }
 0x29e   : > { %707 = vrot.lane.b32.xlu1 %v705_v22, %s1131_s13 }
 0x30c   : > { %v533_v23 = vpop.permute.xlu0 %532 }
 0x30d   : > { %536 = vst.msk [vmem:[%s1279_s11] sm:$0xff] %vm535_vm4, %v533_v23 }
 0x310   : > { %v708_v24 = vpop.permute.xlu1 %707 }
 0x311   : > { %710 = vst.msk [vmem:[%s1279_s11 + $0x8] sm:$0xff] %vm535_vm4, %v708_v24 }
 0x312 PF: > { %s848_s24 = sshll.u32 %s1112_s19, 8  ;;  %s726_s8 = sshll.u32 %s1279_s11, 4  ;;  %s727_s8 = int_to_ptr.vmem [resolvable:$true] %s726_s8 }
 0x313   : > { %s1363_s5 = scalar_lea.hbm %s1417_s4, %s848_s24  ;;  %s712_s13 = scalar_lea.sflag [#allocation5], %s223_s10 }
 0x314   : > { %s1026_s6 = scalar_lea.vmem %s727_s8, 256  ;;  %p1429_p2 = scmp.ne.s32.totalorder %s1422_s28, 0 }
 0x315   : > { %p1027_p0 = scmp.ne.s32.totalorder %s727_s8, %s1026_s6  ;;  %s1134_s12 = smov [#allocation6]  }
 0x316   : > { %s1030_s14 = sshll.u32 %s1134_s12, 4  ;;  %s1031_s14 = int_to_ptr.vmem [resolvable:$false] %s1030_s14 }
 0x317   : > { %p1028_p5 = pnand %p1027_p0, %p1429_p2  ;;  %s1032_s9 = scalar_lea.vmem %s1031_s14, 512 }
 0x318   : > { %p1033_p7 = scmp.lt.s32.totalorder %s727_s8, %s1031_s14  ;;  %p1034_p8 = scmp.lt.s32.totalorder %s1032_s9, %s1026_s6 }
 0x319   : > { %p1029_p6 = pneg %p1028_p5 }
 0x31a   : > { %p1035_p11 = por %p1034_p8, %p1033_p7 }
 0x31c   : > { %p1036_p12 = pnand %p1035_p11, %p1029_p6 }
 0x31e   : > { %1039 = shalt.err (!%p1036_p12)
}
 0x31f   : > { %s1040_s19 = scalar_lea.hbm %s1363_s5, 256  ;;  %s1044_s30 = scalar_lea.hbm %s1417_s4, 512 }
 0x320   : > { %p1041_p1 = scmp.ne.s32.totalorder %s1363_s5, %s1040_s19  ;;  %p1045_p9 = scmp.lt.u32.totalorder %s1363_s5, %s1417_s4 }
 0x321   : > { %p1046_p10 = scmp.lt.u32.totalorder %s1044_s30, %s1040_s19  ;;  %p1048_p0 = scmp.lt.u32.totalorder %s1040_s19, %s1363_s5 }
 0x322   : > { %p1042_p4 = pnand %p1041_p1, %p1429_p2 }
 0x323   : > { %p1047_p13 = por %p1046_p10, %p1045_p9 }
 0x324   : > { %p1043_p3 = pneg %p1042_p4 }
 0x325   : > { %p1049_p5 = por %p1048_p0, %p1047_p13 }
 0x327   : > { %p1050_p6 = pnand %p1049_p5, %p1043_p3 }
 0x329   : > { %1053 = shalt.err (!%p1050_p6)
}
 0x32a   : > { %913 = dma.vmem_to_hbm [thread:$0]  (%p1429_p2), %s727_s8, 256, %s1363_s5, %s712_s13  }
 0x32b PF: > { %p925_p7 = scmp.ge.s32.totalorder %s1124_s22, 2  ;;  %s738_s27 = sand.u32 1, %s1096_s15  }
 0x32c   : > { %p1430_p8 = scmp.ne.s32.totalorder %s1423_s29, 0  ;;  %s739_s18 = scalar_lea.sflag [#allocation5], %s738_s27 }
 0x32e   : > { %p920_p11 = pnand %p925_p7, %p1430_p8 }
 0x330   : > { %1091 = dma.done.wait (!%p920_p11), %s739_s18, 256  }
 0x331   : > { %1093 = vsyncadd (!%p920_p11), %s739_s18, 4294967040  ;;  %s18_s22 = sadd.s32 1, %s1124_s22   ;;  %s1431_s15 = smov %s1100_s16 }
 0x332   : > { %p15_p12 = scmp.ge.s32.totalorder %s18_s22, 6   ;;  %s1432_s16 = smov %s1104_s17 }
 0x333   : > { %s1433_s17 = smov %s1237_s7  ;;  %s1434_s18 = smov %s1116_s20 }
 0x334   : > { %s1435_s19 = smov %s1120_s21  ;;  %s1436_s20 = smov %s1439_s25 }
 0x335   : > { %s1437_s21 = smov %s1443_s26  ;;  %17 = sbr.rel (!%p15_p12) target bundleno = 6 (0x6), region = 88 }
 0x33c   :  { %744 = vsyncpa [#allocation4], 1 }
 0x33d   :  { %746 = vsyncpa [#allocation4 + $0x1], 1 }
 0x33e   :  { %747 = vsyncpa [#allocation5], 1 }
 0x33f   :  { %749 = vsyncpa [#allocation5 + $0x1], 1 }

</bundles_post_ra>
